<compile_context>
chip_gen: v7x
topology: tpu7x:2x2x1
jax: 0.10.0
libtpu: 0.0.40
codegen_flags: <defaults>
</compile_context>

<pallas_src>
import functools

import jax
import jax.numpy as jnp
from jax.experimental import pallas as pl
from jax.experimental.pallas import tpu as pltpu

_LANE = 128
_TM = 256                 # A_hat row tile (bump to 512 for very large N on v5e/v6e)
_TK = 256                 # A_hat reduction tile
_FUSED_MAX_NODES = 512    # below this, run the whole network as one kernel
_VMEM_LIMIT = 32 * 1024 * 1024  # explicit scoped-VMEM limit (safe on v5e/v6e/v7x)


def _round_up(x, m):
    return ((x + m - 1) // m) * m


def _pad2(a, rows, cols):
    return jnp.pad(a, ((0, rows - a.shape[0]), (0, cols - a.shape[1])))


def _full_spec(shape):
    # One block == whole (padded) array; full-array blocks satisfy the (8,128) rule.
    return pl.BlockSpec(shape, lambda i: (0,) * len(shape))


# ----------------------------------------------------------------------------
# Pallas kernels
# ----------------------------------------------------------------------------
def _fused_gcn_kernel(a_ref, x_ref, w_ref, b_ref, lw_ref, lb_ref, o_ref):
    """Entire GCN_Model forward in one kernel (small-graph regime)."""
    a = a_ref[...]                      # [Np, Np] bf16
    h = x_ref[...]                      # [Np, P]  bf16
    for l in range(w_ref.shape[0]):     # static, unrolled layer loop
        xw = jnp.dot(h, w_ref[l], preferred_element_type=jnp.float32)
        agg = jnp.dot(a, xw.astype(jnp.bfloat16),
                      preferred_element_type=jnp.float32)
        h = jnp.maximum(agg + b_ref[l], 0.0).astype(jnp.bfloat16)
    out = jnp.dot(h, lw_ref[...], preferred_element_type=jnp.float32) + lb_ref[...]
    o_ref[...] = out.astype(o_ref.dtype)


def _xw_kernel(x_ref, w_ref, o_ref):
    """Per-layer feature transform X @ W (row-tiled, lane-dense output)."""
    o_ref[...] = jnp.dot(x_ref[...], w_ref[...],
                         preferred_element_type=jnp.float32).astype(o_ref.dtype)


def _agg_kernel(a_ref, xw_ref, b_ref, o_ref, acc_ref, *, tk):
    """relu(A_hat @ XW + b), tiled over (row, k) with an f32 VMEM accumulator."""
    k = pl.program_id(1)

    @pl.when(k == 0)
    def _():
        acc_ref[...] = jnp.zeros_like(acc_ref)

    off = pl.multiple_of(k * tk, tk)
    xw_blk = xw_ref[pl.ds(off, tk), :]          # XW stays VMEM-resident
    acc_ref[...] += jnp.dot(a_ref[...], xw_blk,
                            preferred_element_type=jnp.float32)

    @pl.when(k == pl.num_programs(1) - 1)
    def _():
        o_ref[...] = jnp.maximum(acc_ref[...] + b_ref[...], 0.0).astype(o_ref.dtype)


def _linear_kernel(x_ref, w_ref, b_ref, o_ref):
    h = jnp.dot(x_ref[...], w_ref[...], preferred_element_type=jnp.float32)
    o_ref[...] = (h + b_ref[...]).astype(o_ref.dtype)


# ----------------------------------------------------------------------------
# Tiled per-layer wrappers (large-graph path)
# ----------------------------------------------------------------------------
def _tiled_xw(x, w):
    np_, pin = x.shape
    pout = w.shape[1]
    return pl.pallas_call(
        _xw_kernel,
        out_shape=jax.ShapeDtypeStruct((np_, pout), jnp.bfloat16),
        grid=(np_ // _TM,),
        in_specs=[pl.BlockSpec((_TM, pin), lambda i: (i, 0)),
                  pl.BlockSpec((pin, pout), lambda i: (0, 0))],
        out_specs=pl.BlockSpec((_TM, pout), lambda i: (i, 0)),
        compiler_params=pltpu.CompilerParams(
            dimension_semantics=("parallel",),
            vmem_limit_bytes=_VMEM_LIMIT),
    )(x, w)


def _tiled_aggregate(a, xw, b):
    np_ = a.shape[0]
    pout = xw.shape[1]
    return pl.pallas_call(
        functools.partial(_agg_kernel, tk=_TK),
        out_shape=jax.ShapeDtypeStruct((np_, pout), jnp.bfloat16),
        grid=(np_ // _TM, np_ // _TK),
        in_specs=[pl.BlockSpec((_TM, _TK), lambda i, k: (i, k)),     # A_hat tiles
                  pl.BlockSpec((np_, pout), lambda i, k: (0, 0)),    # XW resident
                  pl.BlockSpec((1, pout), lambda i, k: (0, 0))],     # bias
        out_specs=pl.BlockSpec((_TM, pout), lambda i, k: (i, 0)),
        scratch_shapes=[pltpu.VMEM((_TM, pout), jnp.float32)],
        compiler_params=pltpu.CompilerParams(
            dimension_semantics=("parallel", "arbitrary"),
            vmem_limit_bytes=_VMEM_LIMIT),
    )(a, xw, b)


def _tiled_linear(x, w, b):
    np_, pin = x.shape
    pout = w.shape[1]
    return pl.pallas_call(
        _linear_kernel,
        out_shape=jax.ShapeDtypeStruct((np_, pout), jnp.float32),
        grid=(np_ // _TM,),
        in_specs=[pl.BlockSpec((_TM, pin), lambda i: (i, 0)),
                  pl.BlockSpec((pin, pout), lambda i: (0, 0)),
                  pl.BlockSpec((1, pout), lambda i: (0, 0))],
        out_specs=pl.BlockSpec((_TM, pout), lambda i: (i, 0)),
        compiler_params=pltpu.CompilerParams(
            dimension_semantics=("parallel",),
            vmem_limit_bytes=_VMEM_LIMIT),
    )(x, w, b)


# ----------------------------------------------------------------------------
# Plain-JAX glue: normalized adjacency + parameter construction
# ----------------------------------------------------------------------------
def normalized_adjacency(edge_index, num_nodes):
    """Dense GCN normalization: D^-1/2 (A + I) D^-1/2.

    Duplicate edges accumulate (scatter-add, matching PyG); explicit
    self-loops in edge_index are dropped so the +I does not double count.
    """
    src, dst = edge_index[0], edge_index[1]
    ew = jnp.where(src == dst, 0.0, 1.0).astype(jnp.float32)
    a = jnp.zeros((num_nodes, num_nodes), jnp.float32).at[dst, src].add(ew)
    a = a + jnp.eye(num_nodes, dtype=jnp.float32)
    deg = a.sum(axis=1)
    d_inv_sqrt = jnp.where(deg > 0, jax.lax.rsqrt(deg), 0.0)
    return d_inv_sqrt[:, None] * a * d_inv_sqrt[None, :]


def glorot(key, shape):
    fan_in, fan_out = shape
    limit = jnp.sqrt(6.0 / (fan_in + fan_out))
    return jax.random.uniform(key, shape, jnp.float32, -limit, limit)


def init_params(key, in_features, hidden_size, layers, output_size):
    gcn = []
    dims_in = [in_features] + [hidden_size] * (layers - 1)
    for d_in in dims_in:
        key, kw = jax.random.split(key)
        gcn.append((glorot(kw, (d_in, hidden_size)),
                    jnp.zeros((hidden_size,), jnp.float32)))
    key, kw = jax.random.split(key)
    lin = (glorot(kw, (hidden_size, output_size)),
           jnp.zeros((output_size,), jnp.float32))
    return tuple(gcn), lin


# ----------------------------------------------------------------------------
# Forward passes
# ----------------------------------------------------------------------------
@functools.partial(jax.jit, static_argnums=(4,))
def _forward_fused(x, edge_index, gcn_params, lin_params, num_nodes):
    n, f = x.shape
    h_dim = gcn_params[0][0].shape[1]
    o_dim = lin_params[0].shape[1]
    p = max(_round_up(d, _LANE) for d in (f, h_dim, o_dim))
    np_ = _round_up(num_nodes, _LANE)

    a_hat = normalized_adjacency(edge_index, num_nodes)
    a_p = _pad2(a_hat, np_, np_).astype(jnp.bfloat16)
    x_p = _pad2(x, np_, p).astype(jnp.bfloat16)

    w_stack = jnp.stack([_pad2(w, p, p) for w, _ in gcn_params]).astype(jnp.bfloat16)
    b_stack = jnp.stack([jnp.pad(b, (0, p - b.shape[0]))[None, :]
                         for _, b in gcn_params]).astype(jnp.float32)
    lw = _pad2(lin_params[0], p, p).astype(jnp.bfloat16)
    lb = jnp.pad(lin_params[1], (0, p - o_dim))[None, :].astype(jnp.float32)

    out_p = pl.pallas_call(
        _fused_gcn_kernel,
        out_shape=jax.ShapeDtypeStruct((np_, p), jnp.float32),
        grid=(1,),
        in_specs=[_full_spec(a_p.shape), _full_spec(x_p.shape),
                  _full_spec(w_stack.shape), _full_spec(b_stack.shape),
                  _full_spec(lw.shape), _full_spec(lb.shape)],
        out_specs=_full_spec((np_, p)),
        compiler_params=pltpu.CompilerParams(
            dimension_semantics=("arbitrary",),
            vmem_limit_bytes=_VMEM_LIMIT),
    )(a_p, x_p, w_stack, b_stack, lw, lb)
    return out_p[:num_nodes, :o_dim]


@functools.partial(jax.jit, static_argnums=(4,))
def _forward_tiled(x, edge_index, gcn_params, lin_params, num_nodes):
    n, f = x.shape
    o_dim = lin_params[0].shape[1]
    np_ = _round_up(num_nodes, max(_TM, _TK))

    a_hat = normalized_adjacency(edge_index, num_nodes)
    a_p = _pad2(a_hat, np_, np_).astype(jnp.bfloat16)

    h = _pad2(x, np_, _round_up(f, _LANE)).astype(jnp.bfloat16)
    for w, b in gcn_params:
        pin = _round_up(w.shape[0], _LANE)
        pout = _round_up(w.shape[1], _LANE)
        w_p = _pad2(w, pin, pout).astype(jnp.bfloat16)
        b_p = jnp.pad(b, (0, pout - b.shape[0]))[None, :].astype(jnp.float32)
        xw = _tiled_xw(h, w_p)                  # [np_, pout] bf16
        h = _tiled_aggregate(a_p, xw, b_p)      # [np_, pout] bf16 (relu'd)

    lw, lb = lin_params
    pin = _round_up(lw.shape[0], _LANE)
    pout = _round_up(lw.shape[1], _LANE)
    lw_p = _pad2(lw, pin, pout).astype(jnp.bfloat16)
    lb_p = jnp.pad(lb, (0, pout - lb.shape[0]))[None, :].astype(jnp.float32)
    out = _tiled_linear(h, lw_p, lb_p)          # [np_, pout] f32
    return out[:num_nodes, :o_dim]


def gcn_model_forward(x, edge_index, gcn_params, lin_params, num_nodes):
    """Forward of GCN_Model: (GCNConv -> ReLU) x layers -> Linear."""
    if num_nodes <= _FUSED_MAX_NODES:
        return _forward_fused(x, edge_index, gcn_params, lin_params, num_nodes)
    return _forward_tiled(x, edge_index, gcn_params, lin_params, num_nodes)


def gcn_model_reference(x, edge_index, gcn_params, lin_params, num_nodes):
    """Pure-JAX f32 reference for correctness checks."""
    a_hat = normalized_adjacency(edge_index, num_nodes)
    h = x
    for w, b in gcn_params:
        h = jnp.maximum(a_hat @ (h @ w) + b, 0.0)
    lw, lb = lin_params
    return h @ lw + lb


# ----------------------------------------------------------------------------
if __name__ == "__main__":
    key = jax.random.PRNGKey(0)
    kx, kp, kxb, ks, kd = jax.random.split(key, 5)

    in_features, hidden_size, layers, output_size = 8, 32, 3, 8
    gcn_params, lin_params = init_params(kp, in_features, hidden_size, layers,
                                         output_size)

    # --- small graph (ring): fused single-kernel path -------------------------
    n_small = 16
    x_small = jax.random.normal(kx, (n_small, in_features), jnp.float32)
    s = jnp.arange(n_small, dtype=jnp.int32)
    d = (s + 1) % n_small
    edges_small = jnp.stack([jnp.concatenate([s, d]), jnp.concatenate([d, s])])

    out_small = gcn_model_forward(x_small, edges_small, gcn_params, lin_params,
                                  n_small)
    jax.block_until_ready(out_small)
    ref_small = gcn_model_reference(x_small, edges_small, gcn_params,
                                    lin_params, n_small)
    assert out_small.shape == (n_small, output_size)
    assert jnp.all(jnp.isfinite(out_small))
    assert jnp.allclose(out_small, ref_small, atol=5e-2, rtol=5e-2)

    # --- larger random graph: tiled (parallel, arbitrary) grid path -----------
    n_big, n_edges = 640, 2048
    x_big = jax.random.normal(kxb, (n_big, in_features), jnp.float32)
    src = jax.random.randint(ks, (n_edges,), 0, n_big, dtype=jnp.int32)
    dst = jax.random.randint(kd, (n_edges,), 0, n_big, dtype=jnp.int32)
    edges_big = jnp.stack([jnp.concatenate([src, dst]),
                           jnp.concatenate([dst, src])])

    out_big = gcn_model_forward(x_big, edges_big, gcn_params, lin_params, n_big)
    jax.block_until_ready(out_big)
    ref_big = gcn_model_reference(x_big, edges_big, gcn_params, lin_params,
                                  n_big)
    assert out_big.shape == (n_big, output_size)
    assert jnp.all(jnp.isfinite(out_big))
    assert jnp.allclose(out_big, ref_big, atol=5e-2, rtol=5e-2)

    print("KERNEL_OK")
</pallas_src>

<mosaic_0001>
module attributes {stable_mosaic.version = 11 : i64} {
  func.func private @main(%arg0: i32) attributes {dimension_semantics = [#tpu.dimension_semantics<core_parallel>], iteration_bounds = array<i64: 2>, tpu.core_type = #tpu.core_type<sc_scalar_subcore>, window_params = []} {
    return
  }
}

module attributes {stable_mosaic.version = 11 : i64} {
  func.func private @main(%arg0: i32) attributes {dimension_semantics = [#tpu.dimension_semantics<core_parallel>], iteration_bounds = array<i64: 2>, tpu.core_type = #tpu.core_type<sc_scalar_subcore>, window_params = []} {
    return
  }
}

module attributes {stable_mosaic.version = 11 : i64} {
  func.func @_fused_gcn_kernel(%arg0: i32, %arg1: memref<128x128xbf16, #tpu.memory_space<vmem>>, %arg2: memref<128x128xbf16, #tpu.memory_space<vmem>>, %arg3: memref<3x128x128xbf16, #tpu.memory_space<vmem>>, %arg4: memref<3x1x128xf32, #tpu.memory_space<vmem>>, %arg5: memref<128x128xbf16, #tpu.memory_space<vmem>>, %arg6: memref<1x128xf32, #tpu.memory_space<vmem>>, %arg7: memref<128x128xf32, #tpu.memory_space<vmem>>) attributes {dimension_semantics = [#tpu.dimension_semantics<arbitrary>], iteration_bounds = array<i64: 1>, scalar_prefetch = 0 : i64, scratch_operands = 0 : i64, tpu.core_type = #tpu.core_type<tc>, window_params = [{pipeline_mode = #tpu.pipeline_mode<synchronous>, transform_indices = @transform_0, window_bounds = array<i64: 128, 128>}, {pipeline_mode = #tpu.pipeline_mode<synchronous>, transform_indices = @transform_1, window_bounds = array<i64: 128, 128>}, {pipeline_mode = #tpu.pipeline_mode<synchronous>, transform_indices = @transform_2, window_bounds = array<i64: 3, 128, 128>}, {pipeline_mode = #tpu.pipeline_mode<synchronous>, transform_indices = @transform_3, window_bounds = array<i64: 3, 1, 128>}, {pipeline_mode = #tpu.pipeline_mode<synchronous>, transform_indices = @transform_4, window_bounds = array<i64: 128, 128>}, {pipeline_mode = #tpu.pipeline_mode<synchronous>, transform_indices = @transform_5, window_bounds = array<i64: 1, 128>}, {pipeline_mode = #tpu.pipeline_mode<synchronous>, transform_indices = @transform_6, window_bounds = array<i64: 128, 128>}]} {
    %c0 = arith.constant 0 : index
    %c0_0 = arith.constant 0 : index
    %0 = vector.load %arg1[%c0, %c0_0] : memref<128x128xbf16, #tpu.memory_space<vmem>>, vector<128x128xbf16>
    %c0_1 = arith.constant 0 : index
    %c0_2 = arith.constant 0 : index
    %1 = vector.load %arg2[%c0_1, %c0_2] : memref<128x128xbf16, #tpu.memory_space<vmem>>, vector<128x128xbf16>
    %c0_3 = arith.constant 0 : index
    %c0_4 = arith.constant 0 : index
    %c0_5 = arith.constant 0 : index
    %2 = vector.load %arg3[%c0_3, %c0_4, %c0_5] : memref<3x128x128xbf16, #tpu.memory_space<vmem>>, vector<1x128x128xbf16>
    %3 = vector.shape_cast %2 : vector<1x128x128xbf16> to vector<128x128xbf16>
    %cst = arith.constant dense<0.000000e+00> : vector<128x128xf32>
    %4 = tpu.matmul %1, %3, %cst {dimension_numbers = #tpu.dot_dimension_numbers<[1], [0], [0], [1], [0, 0, 1, 1], [], []>} : vector<128x128xbf16>, vector<128x128xbf16>, vector<128x128xf32> -> vector<128x128xf32>
    %5 = arith.truncf %4 : vector<128x128xf32> to vector<128x128xbf16>
    %cst_6 = arith.constant dense<0.000000e+00> : vector<128x128xf32>
    %6 = tpu.matmul %0, %5, %cst_6 {dimension_numbers = #tpu.dot_dimension_numbers<[1], [0], [0], [1], [0, 0, 1, 1], [], []>} : vector<128x128xbf16>, vector<128x128xbf16>, vector<128x128xf32> -> vector<128x128xf32>
    %c0_7 = arith.constant 0 : index
    %c0_8 = arith.constant 0 : index
    %c0_9 = arith.constant 0 : index
    %7 = vector.load %arg4[%c0_7, %c0_8, %c0_9] : memref<3x1x128xf32, #tpu.memory_space<vmem>>, vector<1x1x128xf32>
    %8 = vector.shape_cast %7 : vector<1x1x128xf32> to vector<1x128xf32>
    %9 = vector.broadcast %8 : vector<1x128xf32> to vector<128x128xf32>
    %10 = arith.addf %6, %9 : vector<128x128xf32>
    %cst_10 = arith.constant 0.000000e+00 : f32
    %11 = vector.broadcast %cst_10 : f32 to vector<128x128xf32>
    %12 = arith.maximumf %10, %11 : vector<128x128xf32>
    %13 = arith.truncf %12 : vector<128x128xf32> to vector<128x128xbf16>
    %c1 = arith.constant 1 : index
    %c0_11 = arith.constant 0 : index
    %c0_12 = arith.constant 0 : index
    %14 = vector.load %arg3[%c1, %c0_11, %c0_12] : memref<3x128x128xbf16, #tpu.memory_space<vmem>>, vector<1x128x128xbf16>
    %15 = vector.shape_cast %14 : vector<1x128x128xbf16> to vector<128x128xbf16>
    %cst_13 = arith.constant dense<0.000000e+00> : vector<128x128xf32>
    %16 = tpu.matmul %13, %15, %cst_13 {dimension_numbers = #tpu.dot_dimension_numbers<[1], [0], [0], [1], [0, 0, 1, 1], [], []>} : vector<128x128xbf16>, vector<128x128xbf16>, vector<128x128xf32> -> vector<128x128xf32>
    %17 = arith.truncf %16 : vector<128x128xf32> to vector<128x128xbf16>
    %cst_14 = arith.constant dense<0.000000e+00> : vector<128x128xf32>
    %18 = tpu.matmul %0, %17, %cst_14 {dimension_numbers = #tpu.dot_dimension_numbers<[1], [0], [0], [1], [0, 0, 1, 1], [], []>} : vector<128x128xbf16>, vector<128x128xbf16>, vector<128x128xf32> -> vector<128x128xf32>
    %c1_15 = arith.constant 1 : index
    %c0_16 = arith.constant 0 : index
    %c0_17 = arith.constant 0 : index
    %19 = vector.load %arg4[%c1_15, %c0_16, %c0_17] : memref<3x1x128xf32, #tpu.memory_space<vmem>>, vector<1x1x128xf32>
    %20 = vector.shape_cast %19 : vector<1x1x128xf32> to vector<1x128xf32>
    %21 = vector.broadcast %20 : vector<1x128xf32> to vector<128x128xf32>
    %22 = arith.addf %18, %21 : vector<128x128xf32>
    %cst_18 = arith.constant 0.000000e+00 : f32
    %23 = vector.broadcast %cst_18 : f32 to vector<128x128xf32>
    %24 = arith.maximumf %22, %23 : vector<128x128xf32>
    %25 = arith.truncf %24 : vector<128x128xf32> to vector<128x128xbf16>
    %c2 = arith.constant 2 : index
    %c0_19 = arith.constant 0 : index
    %c0_20 = arith.constant 0 : index
    %26 = vector.load %arg3[%c2, %c0_19, %c0_20] : memref<3x128x128xbf16, #tpu.memory_space<vmem>>, vector<1x128x128xbf16>
    %27 = vector.shape_cast %26 : vector<1x128x128xbf16> to vector<128x128xbf16>
    %cst_21 = arith.constant dense<0.000000e+00> : vector<128x128xf32>
    %28 = tpu.matmul %25, %27, %cst_21 {dimension_numbers = #tpu.dot_dimension_numbers<[1], [0], [0], [1], [0, 0, 1, 1], [], []>} : vector<128x128xbf16>, vector<128x128xbf16>, vector<128x128xf32> -> vector<128x128xf32>
    %29 = arith.truncf %28 : vector<128x128xf32> to vector<128x128xbf16>
    %cst_22 = arith.constant dense<0.000000e+00> : vector<128x128xf32>
    %30 = tpu.matmul %0, %29, %cst_22 {dimension_numbers = #tpu.dot_dimension_numbers<[1], [0], [0], [1], [0, 0, 1, 1], [], []>} : vector<128x128xbf16>, vector<128x128xbf16>, vector<128x128xf32> -> vector<128x128xf32>
    %c2_23 = arith.constant 2 : index
    %c0_24 = arith.constant 0 : index
    %c0_25 = arith.constant 0 : index
    %31 = vector.load %arg4[%c2_23, %c0_24, %c0_25] : memref<3x1x128xf32, #tpu.memory_space<vmem>>, vector<1x1x128xf32>
    %32 = vector.shape_cast %31 : vector<1x1x128xf32> to vector<1x128xf32>
    %33 = vector.broadcast %32 : vector<1x128xf32> to vector<128x128xf32>
    %34 = arith.addf %30, %33 : vector<128x128xf32>
    %cst_26 = arith.constant 0.000000e+00 : f32
    %35 = vector.broadcast %cst_26 : f32 to vector<128x128xf32>
    %36 = arith.maximumf %34, %35 : vector<128x128xf32>
    %37 = arith.truncf %36 : vector<128x128xf32> to vector<128x128xbf16>
    %c0_27 = arith.constant 0 : index
    %c0_28 = arith.constant 0 : index
    %38 = vector.load %arg5[%c0_27, %c0_28] : memref<128x128xbf16, #tpu.memory_space<vmem>>, vector<128x128xbf16>
    %cst_29 = arith.constant dense<0.000000e+00> : vector<128x128xf32>
    %39 = tpu.matmul %37, %38, %cst_29 {dimension_numbers = #tpu.dot_dimension_numbers<[1], [0], [0], [1], [0, 0, 1, 1], [], []>} : vector<128x128xbf16>, vector<128x128xbf16>, vector<128x128xf32> -> vector<128x128xf32>
    %c0_30 = arith.constant 0 : index
    %c0_31 = arith.constant 0 : index
    %40 = vector.load %arg6[%c0_30, %c0_31] : memref<1x128xf32, #tpu.memory_space<vmem>>, vector<1x128xf32>
    %41 = vector.broadcast %40 : vector<1x128xf32> to vector<128x128xf32>
    %42 = arith.addf %39, %41 : vector<128x128xf32>
    %c0_32 = arith.constant 0 : index
    %c0_33 = arith.constant 0 : index
    %43 = vector.load %arg7[%c0_32, %c0_33] : memref<128x128xf32, #tpu.memory_space<vmem>>, vector<128x128xf32>
    tpu.vector_store %arg7[%c0_32, %c0_33], %42 {strides = array<i32>} : memref<128x128xf32, #tpu.memory_space<vmem>>, vector<128x128xf32>,
    return
  }
  func.func @transform_0(%arg0: i32) -> (i32, i32) {
    %c0_i32 = arith.constant 0 : i32
    %c0_i32_0 = arith.constant 0 : i32
    %c0_i32_1 = arith.constant 0 : i32
    return %c0_i32, %c0_i32_0 : i32, i32
  }
  func.func @transform_1(%arg0: i32) -> (i32, i32) {
    %c0_i32 = arith.constant 0 : i32
    %c0_i32_0 = arith.constant 0 : i32
    %c0_i32_1 = arith.constant 0 : i32
    return %c0_i32, %c0_i32_0 : i32, i32
  }
  func.func @transform_2(%arg0: i32) -> (i32, i32, i32) {
    %c0_i32 = arith.constant 0 : i32
    %c0_i32_0 = arith.constant 0 : i32
    %c0_i32_1 = arith.constant 0 : i32
    %c0_i32_2 = arith.constant 0 : i32
    return %c0_i32, %c0_i32_0, %c0_i32_1 : i32, i32, i32
  }
  func.func @transform_3(%arg0: i32) -> (i32, i32, i32) {
    %c0_i32 = arith.constant 0 : i32
    %c0_i32_0 = arith.constant 0 : i32
    %c0_i32_1 = arith.constant 0 : i32
    %c0_i32_2 = arith.constant 0 : i32
    return %c0_i32, %c0_i32_0, %c0_i32_1 : i32, i32, i32
  }
  func.func @transform_4(%arg0: i32) -> (i32, i32) {
    %c0_i32 = arith.constant 0 : i32
    %c0_i32_0 = arith.constant 0 : i32
    %c0_i32_1 = arith.constant 0 : i32
    return %c0_i32, %c0_i32_0 : i32, i32
  }
  func.func @transform_5(%arg0: i32) -> (i32, i32) {
    %c0_i32 = arith.constant 0 : i32
    %c0_i32_0 = arith.constant 0 : i32
    %c0_i32_1 = arith.constant 0 : i32
    return %c0_i32, %c0_i32_0 : i32, i32
  }
  func.func @transform_6(%arg0: i32) -> (i32, i32) {
    %c0_i32 = arith.constant 0 : i32
    %c0_i32_0 = arith.constant 0 : i32
    %c0_i32_1 = arith.constant 0 : i32
    return %c0_i32, %c0_i32_0 : i32, i32
  }
}

</mosaic_0001>

<bundles_post_ra>
// kernel: _forward_fused.1
= control target key start
LH: loop header
LB: loop body
LE: loop exit
PB: predicated region body
PF: predicated region fallthrough
CT: control target
= control target key end

     0   :  { %s2000_s2 = inlined_call_operand.vmem [shape: bf16[3,128,128], index: 2, kind: input, shape index: {}]   ;;  %s2001_s1 = inlined_call_operand.vmem [shape: bf16[128,128], index: 1, kind: input, shape index: {}]   ;;  %s2002_s0 = inlined_call_operand.vmem [shape: bf16[128,128], index: 0, kind: input, shape index: {}]   ;;  %s2003_s3 = inlined_call_operand.vmem [shape: f32[3,1,128], index: 3, kind: input, shape index: {}]   ;;  %s2004_s4 = inlined_call_operand.vmem [shape: bf16[128,128], index: 4, kind: input, shape index: {}]   ;;  %s2005_s5 = inlined_call_operand.vmem [shape: f32[1,128], index: 5, kind: input, shape index: {}]   ;;  %s2006_s6 = inlined_call_operand.vmem [shape: f32[128,128], index: 6, kind: output, shape index: {}]  }
   0x1   :  { %v1673_v0 = vld [vmem:[%s2000_s2] sm:$0xff]   ;;  %v1674_v1 = vld [vmem:[%s2000_s2 + $0x8] sm:$0xff]   ;;  %v1675_v2 = vld [vmem:[%s2000_s2 + $0x10] sm:$0xff]  }
   0x2   :  { %1433 = vmatprep.subr.bf16.mxu0 %v1673_v0  ;;  %v1676_v3 = vld [vmem:[%s2000_s2 + $0x18] sm:$0xff]   ;;  %v1681_v4 = vld [vmem:[%s2001_s1] sm:$0xff]   ;;  %v1678_v6 = vld [vmem:[%s2000_s2 + $0x28] sm:$0xff]  }
   0x3   :  { %1434 = vmatpush3.bf16.msra.mxu0 %v1673_v0  ;;  %1449 = vmatprep.mubr.bf16.mxu0 %v1681_v4  ;;  %v1677_v5 = vld [vmem:[%s2000_s2 + $0x20] sm:$0xff]   ;;  %v1679_v7 = vld [vmem:[%s2000_s2 + $0x30] sm:$0xff]   ;;  %v1680_v8 = vld [vmem:[%s2000_s2 + $0x38] sm:$0xff]  }
   0x4   :  { %1435 = vmatprep.subr.bf16.mxu0 %v1674_v1  ;;  %v1682_v9 = vld [vmem:[%s2001_s1 + $0x8] sm:$0xff]   ;;  %v1683_v10 = vld [vmem:[%s2001_s1 + $0x10] sm:$0xff]   ;;  %v1684_v11 = vld [vmem:[%s2001_s1 + $0x18] sm:$0xff]  }
   0x5   :  { %v1685_v12 = vld [vmem:[%s2001_s1 + $0x20] sm:$0xff]   ;;  %v1686_v13 = vld [vmem:[%s2001_s1 + $0x28] sm:$0xff]   ;;  %v1687_v14 = vld [vmem:[%s2001_s1 + $0x30] sm:$0xff]  }
   0x6   :  { %v1688_v15 = vld [vmem:[%s2001_s1 + $0x38] sm:$0xff]   ;;  %v1807_v16 = vld [vmem:[%s2002_s0] sm:$0xff]   ;;  %v1698_v18 = vld [vmem:[%s2000_s2 + $0x48] sm:$0xff]  }
   0x7   :  { %1436 = vmatpush3.bf16.msra.mxu0 %v1674_v1  ;;  %1481 = vmatprep.mubr.bf16.mxu1 %v1807_v16  ;;  %v1697_v17 = vld [vmem:[%s2000_s2 + $0x40] sm:$0xff]   ;;  %v1699_v19 = vld [vmem:[%s2000_s2 + $0x50] sm:$0xff]   ;;  %v1700_v20 = vld [vmem:[%s2000_s2 + $0x58] sm:$0xff]  }
   0x8   :  { %1437 = vmatprep.subr.bf16.mxu0 %v1675_v2  ;;  %v1701_v21 = vld [vmem:[%s2000_s2 + $0x60] sm:$0xff]   ;;  %v1702_v22 = vld [vmem:[%s2000_s2 + $0x68] sm:$0xff]   ;;  %v1836_v48 = vld [vmem:[%s2002_s0 + $0x10] sm:$0xff]  }
   0x9   :  { %v1831_v47 = vld [vmem:[%s2002_s0 + $0x8] sm:$0xff]   ;;  %v1843_v49 = vld [vmem:[%s2002_s0 + $0x18] sm:$0xff]   ;;  %v1848_v50 = vld [vmem:[%s2002_s0 + $0x20] sm:$0xff]  }
   0xa   :  { %v1855_v51 = vld [vmem:[%s2002_s0 + $0x28] sm:$0xff]   ;;  %v1860_v52 = vld [vmem:[%s2002_s0 + $0x30] sm:$0xff]   ;;  %v1867_v53 = vld [vmem:[%s2002_s0 + $0x38] sm:$0xff]  }
   0xb   :  { %1438 = vmatpush3.bf16.msra.mxu0 %v1675_v2  ;;  %v1703_v54 = vld [vmem:[%s2000_s2 + $0x70] sm:$0xff]   ;;  %v1704_v55 = vld [vmem:[%s2000_s2 + $0x78] sm:$0xff]   ;;  %v1251_v56 = vld [vmem:[%s2003_s3] ss:$0 sm:$0xff] }
   0xc   :  { %1439 = vmatprep.subr.bf16.mxu0 %v1676_v3 }
   0xf   :  { %1440 = vmatpush3.bf16.msra.mxu0 %v1676_v3 }
  0x10   :  { %1441 = vmatprep.subr.bf16.mxu0 %v1677_v5 }
  0x13   :  { %1442 = vmatpush3.bf16.msra.mxu0 %v1677_v5 }
  0x14   :  { %1443 = vmatprep.subr.bf16.mxu0 %v1678_v6 }
  0x17   :  { %1444 = vmatpush3.bf16.msra.mxu0 %v1678_v6 }
  0x18   :  { %1445 = vmatprep.subr.bf16.mxu0 %v1679_v7 }
  0x1b   :  { %1446 = vmatpush3.bf16.msra.mxu0 %v1679_v7 }
  0x1c   :  { %1447 = vmatprep.subr.bf16.mxu0 %v1680_v8 }
  0x1f   :  { %1448 = vmatpush3.bf16.msra.mxu0 %v1680_v8 }
  0x20   :  { %1497 = vmatprep.subr.bf16.mxu0 %v1697_v17 }
  0x22   :  { %1450 = vmatmul.mubr.bf16.vlgmr.msra.gmra.mrb[0].mxu0 %v1682_v9 }
  0x23   :  { %1453 = vmatprep.mubr.bf16.mxu0 %v1683_v10  ;;  %1498 = vmatpush3.bf16.msra.mxu0 %v1697_v17 }
  0x24   :  { %1499 = vmatprep.subr.bf16.mxu0 %v1698_v18 }
  0x27   :  { %1500 = vmatpush3.bf16.msra.mxu0 %v1698_v18 }
  0x28   :  { %1501 = vmatprep.subr.bf16.mxu0 %v1699_v19 }
  0x2a   :  { %1454 = vmatmul.mubr.bf16.gmra.mrb[4].mxu0 %v1684_v11 }
  0x2b   :  { %1457 = vmatprep.mubr.bf16.mxu0 %v1685_v12  ;;  %1502 = vmatpush3.bf16.msra.mxu0 %v1699_v19 }
  0x2c   :  { %1503 = vmatprep.subr.bf16.mxu0 %v1700_v20 }
  0x2f   :  { %1504 = vmatpush3.bf16.msra.mxu0 %v1700_v20 }
  0x30   :  { %1505 = vmatprep.subr.bf16.mxu0 %v1701_v21 }
  0x32   :  { %1458 = vmatmul.mubr.bf16.gmra.mrb[8].mxu0 %v1686_v13 }
  0x33   :  { %1461 = vmatprep.mubr.bf16.mxu0 %v1687_v14  ;;  %1506 = vmatpush3.bf16.msra.mxu0 %v1701_v21 }
  0x34   :  { %1507 = vmatprep.subr.bf16.mxu0 %v1702_v22 }
  0x37   :  { %1508 = vmatpush3.bf16.msra.mxu0 %v1702_v22 }
  0x38   :  { %1509 = vmatprep.subr.bf16.mxu0 %v1703_v54 }
  0x3a   :  { %1462 = vmatmul.mubr.bf16.gmra.mrb[12].mxu0 %v1688_v15 }
  0x3b   :  { %1510 = vmatpush3.bf16.msra.mxu0 %v1703_v54 }
  0x3c   :  { %1511 = vmatprep.subr.bf16.mxu0 %v1704_v55 }
  0x3f   :  { %1512 = vmatpush3.bf16.msra.mxu0 %v1704_v55 }
  0xf5   :  { %v1451_v23 = vpop.f32.mrb[0].mxu0 }
  0xf6   :  { %v202_v24 = vpop.f32.mrb[1].mxu0 }
  0xf7   :  { %v1452_v25 = vpop.f32.mrb[2].mxu0 }
  0xf8   :  { %v266_v26 = vpack.c.bf16 %v1452_v25, %v1451_v23  ;;  %v205_v27 = vpop.f32.mrb[3].mxu0 }
  0xf9   :  { %v265_v28 = vpack.c.bf16 %v205_v27, %v202_v24 }
  0xfb   :  { %1465 = vmatprep.subr.bf16.mxu1 %v265_v28 }
  0xfc   :  { %1466 = vmatpush3.bf16.msra.mxu1 %v265_v28 }
  0xfd   :  { %v1455_v29 = vpop.f32.mrb[4].mxu0  ;;  %1467 = vmatprep.subr.bf16.mxu1 %v266_v26 }
  0xfe   :  { %v218_v30 = vpop.f32.mrb[5].mxu0 }
  0xff   :  { %v1456_v31 = vpop.f32.mrb[6].mxu0 }
 0x100   :  { %v268_v32 = vpack.c.bf16 %v1456_v31, %v1455_v29  ;;  %v221_v33 = vpop.f32.mrb[7].mxu0  ;;  %1468 = vmatpush3.bf16.msra.mxu1 %v266_v26 }
 0x101   :  { %v267_v34 = vpack.c.bf16 %v221_v33, %v218_v30 }
 0x103   :  { %1469 = vmatprep.subr.bf16.mxu1 %v267_v34 }
 0x104   :  { %1470 = vmatpush3.bf16.msra.mxu1 %v267_v34 }
 0x105   :  { %v1459_v35 = vpop.f32.mrb[8].mxu0  ;;  %1471 = vmatprep.subr.bf16.mxu1 %v268_v32 }
 0x106   :  { %v234_v36 = vpop.f32.mrb[9].mxu0 }
 0x107   :  { %v1460_v37 = vpop.f32.mrb[10].mxu0 }
 0x108   :  { %v270_v38 = vpack.c.bf16 %v1460_v37, %v1459_v35  ;;  %v237_v39 = vpop.f32.mrb[11].mxu0  ;;  %1472 = vmatpush3.bf16.msra.mxu1 %v268_v32 }
 0x109   :  { %v269_v40 = vpack.c.bf16 %v237_v39, %v234_v36 }
 0x10b   :  { %1473 = vmatprep.subr.bf16.mxu1 %v269_v40 }
 0x10c   :  { %1474 = vmatpush3.bf16.msra.mxu1 %v269_v40 }
 0x10d   :  { %v1463_v41 = vpop.f32.mrb[12].mxu0  ;;  %1475 = vmatprep.subr.bf16.mxu1 %v270_v38 }
 0x10e   :  { %v250_v42 = vpop.f32.mrb[13].mxu0 }
 0x10f   :  { %v1464_v43 = vpop.f32.mrb[14].mxu0 }
 0x110   :  { %v272_v44 = vpack.c.bf16 %v1464_v43, %v1463_v41  ;;  %v253_v45 = vpop.f32.mrb[15].mxu0  ;;  %1476 = vmatpush3.bf16.msra.mxu1 %v270_v38 }
 0x111   :  { %v271_v46 = vpack.c.bf16 %v253_v45, %v250_v42 }
 0x113   :  { %1477 = vmatprep.subr.bf16.mxu1 %v271_v46 }
 0x114   :  { %1478 = vmatpush3.bf16.msra.mxu1 %v271_v46 }
 0x115   :  { %1479 = vmatprep.subr.bf16.mxu1 %v272_v44 }
 0x118   :  { %1480 = vmatpush3.bf16.msra.mxu1 %v272_v44 }
 0x11b   :  { %1482 = vmatmul.mubr.bf16.vlgmr.msra.gmra.mrb[0].mxu1 %v1831_v47 }
 0x11c   :  { %1485 = vmatprep.mubr.bf16.mxu1 %v1836_v48 }
 0x123   :  { %1486 = vmatmul.mubr.bf16.gmra.mrb[4].mxu1 %v1843_v49 }
 0x124   :  { %1489 = vmatprep.mubr.bf16.mxu1 %v1848_v50 }
 0x12b   :  { %1490 = vmatmul.mubr.bf16.gmra.mrb[8].mxu1 %v1855_v51 }
 0x12c   :  { %1493 = vmatprep.mubr.bf16.mxu1 %v1860_v52 }
 0x133   :  { %1494 = vmatmul.mubr.bf16.gmra.mrb[12].mxu1 %v1867_v53 }
 0x134   :  { %1545 = vmatprep.mubr.bf16.mxu1 %v1807_v16 }
 0x1ee   :  { %v1483_v57 = vpop.f32.mrb[0].mxu1 }
 0x1ef   :  { %v371_v58 = vadd.f32 %v1483_v57, %v1251_v56  ;;  %v362_v59 = vpop.f32.mrb[1].mxu1 }
 0x1f0   :  { %v363_v60 = vadd.f32 %v1251_v56, %v362_v59  ;;  %v1484_v61 = vpop.f32.mrb[2].mxu1  ;;  %v1706_v59 = vld [vmem:[%s2000_s2 + $0x88] sm:$0xff]  }
 0x1f1   :  { %v374_v62 = vadd.f32 %v1484_v61, %v1251_v56  ;;  %v365_v63 = vpop.f32.mrb[3].mxu1  ;;  %v427_v1 = vmax.f32 %v371_v58, 0.0  ;;  %v1705_v58 = vld [vmem:[%s2000_s2 + $0x80] sm:$0xff]  }
 0x1f2   :  { %v366_v0 = vadd.f32 %v1251_v56, %v365_v63  ;;  %v425_v3 = vmax.f32 %v363_v60, 0.0  ;;  %1561 = vmatprep.subr.bf16.mxu0 %v1705_v58  ;;  %v1708_v60 = vld [vmem:[%s2000_s2 + $0x98] sm:$0xff]   ;;  %v1709_v61 = vld [vmem:[%s2000_s2 + $0xa0] sm:$0xff]  }
 0x1f3   :  { %v428_v2 = vmax.f32 %v374_v62, 0.0  ;;  %v1710_v62 = vld [vmem:[%s2000_s2 + $0xa8] sm:$0xff]  }
 0x1f4   :  { %v426_v4 = vmax.f32 %v366_v0, 0.0 }
 0x1f5   :  { %v442_v5 = vpack.c.bf16 %v428_v2, %v427_v1 }
 0x1f6   :  { %v441_v6 = vpack.c.bf16 %v426_v4, %v425_v3  ;;  %v1487_v7 = vpop.f32.mrb[4].mxu1 }
 0x1f7   :  { %v387_v8 = vadd.f32 %v1487_v7, %v1251_v56  ;;  %v378_v9 = vpop.f32.mrb[5].mxu1 }
 0x1f8   :  { %v379_v10 = vadd.f32 %v1251_v56, %v378_v9  ;;  %v1488_v11 = vpop.f32.mrb[6].mxu1  ;;  %1513 = vmatprep.mubr.bf16.mxu0 %v441_v6 }
 0x1f9   :  { %v390_v12 = vadd.f32 %v1488_v11, %v1251_v56  ;;  %v381_v13 = vpop.f32.mrb[7].mxu1  ;;  %1514 = vmatmul.mubr.bf16.vlgmr.msra.gmra.mrb[16].mxu0 %v442_v5  ;;  %v431_v15 = vmax.f32 %v387_v8, 0.0 }
 0x1fa   :  { %v382_v14 = vadd.f32 %v1251_v56, %v381_v13  ;;  %v429_v18 = vmax.f32 %v379_v10, 0.0  ;;  %1562 = vmatpush3.bf16.msra.mxu0 %v1705_v58 }
 0x1fb   :  { %v432_v17 = vmax.f32 %v390_v12, 0.0  ;;  %1563 = vmatprep.subr.bf16.mxu0 %v1706_v59 }
 0x1fc   :  { %v430_v19 = vmax.f32 %v382_v14, 0.0 }
 0x1fd   :  { %v444_v20 = vpack.c.bf16 %v432_v17, %v431_v15 }
 0x1fe   :  { %v443_v21 = vpack.c.bf16 %v430_v19, %v429_v18  ;;  %v1491_v22 = vpop.f32.mrb[8].mxu1  ;;  %1564 = vmatpush3.bf16.msra.mxu0 %v1706_v59 }
 0x1ff   :  { %v403_v23 = vadd.f32 %v1491_v22, %v1251_v56  ;;  %v394_v24 = vpop.f32.mrb[9].mxu1 }
 0x200   :  { %v395_v25 = vadd.f32 %v1251_v56, %v394_v24  ;;  %v1492_v26 = vpop.f32.mrb[10].mxu1  ;;  %1517 = vmatprep.mubr.bf16.mxu0 %v443_v21  ;;  %v1711_v24 = vld [vmem:[%s2000_s2 + $0xb0] sm:$0xff]  }
 0x201   :  { %v406_v27 = vadd.f32 %v1492_v26, %v1251_v56  ;;  %v397_v28 = vpop.f32.mrb[11].mxu1  ;;  %1518 = vmatmul.mubr.bf16.gmra.mrb[20].mxu0 %v444_v20  ;;  %v435_v30 = vmax.f32 %v403_v23, 0.0  ;;  %v1285_v26 = vld [vmem:[%s2003_s3 + $0x1] ss:$0 sm:$0xff] }
 0x202   :  { %v398_v29 = vadd.f32 %v1251_v56, %v397_v28  ;;  %v433_v32 = vmax.f32 %v395_v25, 0.0  ;;  %v1712_v25 = vld [vmem:[%s2000_s2 + $0xb8] sm:$0xff]  }
 0x203   :  { %v436_v31 = vmax.f32 %v406_v27, 0.0 }
 0x204   :  { %v434_v33 = vmax.f32 %v398_v29, 0.0 }
 0x205   :  { %v446_v34 = vpack.c.bf16 %v436_v31, %v435_v30 }
 0x206   :  { %v445_v35 = vpack.c.bf16 %v434_v33, %v433_v32  ;;  %v1495_v36 = vpop.f32.mrb[12].mxu1 }
 0x207   :  { %v419_v37 = vadd.f32 %v1495_v36, %v1251_v56  ;;  %v410_v38 = vpop.f32.mrb[13].mxu1 }
 0x208   :  { %v411_v39 = vadd.f32 %v1251_v56, %v410_v38  ;;  %v1496_v40 = vpop.f32.mrb[14].mxu1  ;;  %1521 = vmatprep.mubr.bf16.mxu0 %v445_v35 }
 0x209   :  { %v422_v41 = vadd.f32 %v1496_v40, %v1251_v56  ;;  %v413_v42 = vpop.f32.mrb[15].mxu1  ;;  %1522 = vmatmul.mubr.bf16.gmra.mrb[24].mxu0 %v446_v34  ;;  %v439_v44 = vmax.f32 %v419_v37, 0.0 }
 0x20a   :  { %v414_v43 = vadd.f32 %v1251_v56, %v413_v42  ;;  %v437_v46 = vmax.f32 %v411_v39, 0.0  ;;  %v1707_v56 = vld [vmem:[%s2000_s2 + $0x90] sm:$0xff]  }
 0x20b   :  { %v440_v45 = vmax.f32 %v422_v41, 0.0  ;;  %1565 = vmatprep.subr.bf16.mxu0 %v1707_v56 }
 0x20c   :  { %v438_v54 = vmax.f32 %v414_v43, 0.0  ;;  %1566 = vmatpush3.bf16.msra.mxu0 %v1707_v56 }
 0x20d   :  { %v448_v55 = vpack.c.bf16 %v440_v45, %v439_v44  ;;  %1567 = vmatprep.subr.bf16.mxu0 %v1708_v60 }
 0x20e   :  { %v447_v57 = vpack.c.bf16 %v438_v54, %v437_v46 }
 0x210   :  { %1525 = vmatprep.mubr.bf16.mxu0 %v447_v57  ;;  %1568 = vmatpush3.bf16.msra.mxu0 %v1708_v60 }
 0x211   :  { %1526 = vmatmul.mubr.bf16.gmra.mrb[28].mxu0 %v448_v55  ;;  %1569 = vmatprep.subr.bf16.mxu0 %v1709_v61 }
 0x214   :  { %1570 = vmatpush3.bf16.msra.mxu0 %v1709_v61 }
 0x215   :  { %1571 = vmatprep.subr.bf16.mxu0 %v1710_v62 }
 0x218   :  { %1572 = vmatpush3.bf16.msra.mxu0 %v1710_v62 }
 0x219   :  { %1573 = vmatprep.subr.bf16.mxu0 %v1711_v24 }
 0x21c   :  { %1574 = vmatpush3.bf16.msra.mxu0 %v1711_v24 }
 0x21d   :  { %1575 = vmatprep.subr.bf16.mxu0 %v1712_v25 }
 0x220   :  { %1576 = vmatpush3.bf16.msra.mxu0 %v1712_v25 }
 0x2cc   :  { %v1515_v63 = vpop.f32.mrb[16].mxu0 }
 0x2cd   :  { %v548_v0 = vpop.f32.mrb[17].mxu0 }
 0x2ce   :  { %v1516_v1 = vpop.f32.mrb[18].mxu0 }
 0x2cf   :  { %v612_v2 = vpack.c.bf16 %v1516_v1, %v1515_v63  ;;  %v551_v3 = vpop.f32.mrb[19].mxu0 }
 0x2d0   :  { %v611_v4 = vpack.c.bf16 %v551_v3, %v548_v0 }
 0x2d2   :  { %1529 = vmatprep.subr.bf16.mxu1 %v611_v4 }
 0x2d3   :  { %1530 = vmatpush3.bf16.msra.mxu1 %v611_v4 }
 0x2d4   :  { %v1519_v5 = vpop.f32.mrb[20].mxu0  ;;  %1531 = vmatprep.subr.bf16.mxu1 %v612_v2 }
 0x2d5   :  { %v564_v6 = vpop.f32.mrb[21].mxu0 }
 0x2d6   :  { %v1520_v7 = vpop.f32.mrb[22].mxu0 }
 0x2d7   :  { %v614_v8 = vpack.c.bf16 %v1520_v7, %v1519_v5  ;;  %v567_v9 = vpop.f32.mrb[23].mxu0  ;;  %1532 = vmatpush3.bf16.msra.mxu1 %v612_v2 }
 0x2d8   :  { %v613_v10 = vpack.c.bf16 %v567_v9, %v564_v6 }
 0x2da   :  { %1533 = vmatprep.subr.bf16.mxu1 %v613_v10 }
 0x2db   :  { %1534 = vmatpush3.bf16.msra.mxu1 %v613_v10 }
 0x2dc   :  { %v1523_v11 = vpop.f32.mrb[24].mxu0  ;;  %1535 = vmatprep.subr.bf16.mxu1 %v614_v8 }
 0x2dd   :  { %v580_v12 = vpop.f32.mrb[25].mxu0 }
 0x2de   :  { %v1524_v13 = vpop.f32.mrb[26].mxu0 }
 0x2df   :  { %v616_v14 = vpack.c.bf16 %v1524_v13, %v1523_v11  ;;  %v583_v15 = vpop.f32.mrb[27].mxu0  ;;  %1536 = vmatpush3.bf16.msra.mxu1 %v614_v8 }
 0x2e0   :  { %v615_v17 = vpack.c.bf16 %v583_v15, %v580_v12 }
 0x2e2   :  { %1537 = vmatprep.subr.bf16.mxu1 %v615_v17 }
 0x2e3   :  { %1538 = vmatpush3.bf16.msra.mxu1 %v615_v17 }
 0x2e4   :  { %v1527_v18 = vpop.f32.mrb[28].mxu0  ;;  %1539 = vmatprep.subr.bf16.mxu1 %v616_v14 }
 0x2e5   :  { %v596_v19 = vpop.f32.mrb[29].mxu0 }
 0x2e6   :  { %v1528_v20 = vpop.f32.mrb[30].mxu0 }
 0x2e7   :  { %v618_v21 = vpack.c.bf16 %v1528_v20, %v1527_v18  ;;  %v599_v22 = vpop.f32.mrb[31].mxu0  ;;  %1540 = vmatpush3.bf16.msra.mxu1 %v616_v14 }
 0x2e8   :  { %v617_v23 = vpack.c.bf16 %v599_v22, %v596_v19 }
 0x2ea   :  { %1541 = vmatprep.subr.bf16.mxu1 %v617_v23 }
 0x2eb   :  { %1542 = vmatpush3.bf16.msra.mxu1 %v617_v23 }
 0x2ec   :  { %1543 = vmatprep.subr.bf16.mxu1 %v618_v21 }
 0x2ef   :  { %1544 = vmatpush3.bf16.msra.mxu1 %v618_v21 }
 0x2f2   :  { %1546 = vmatmul.mubr.bf16.vlgmr.msra.gmra.mrb[16].mxu1 %v1831_v47 }
 0x2f3   :  { %1549 = vmatprep.mubr.bf16.mxu1 %v1836_v48 }
 0x2fa   :  { %1550 = vmatmul.mubr.bf16.gmra.mrb[20].mxu1 %v1843_v49 }
 0x2fb   :  { %1553 = vmatprep.mubr.bf16.mxu1 %v1848_v50 }
 0x302   :  { %1554 = vmatmul.mubr.bf16.gmra.mrb[24].mxu1 %v1855_v51 }
 0x303   :  { %1557 = vmatprep.mubr.bf16.mxu1 %v1860_v52 }
 0x30a   :  { %1558 = vmatmul.mubr.bf16.gmra.mrb[28].mxu1 %v1867_v53 }
 0x30b   :  { %1609 = vmatprep.mubr.bf16.mxu1 %v1807_v16 }
 0x3c5   :  { %v1547_v27 = vpop.f32.mrb[16].mxu1 }
 0x3c6   :  { %v670_v28 = vadd.f32 %v1547_v27, %v1285_v26  ;;  %v661_v29 = vpop.f32.mrb[17].mxu1  ;;  %v1713_v27 = vld [vmem:[%s2004_s4] sm:$0xff]  }
 0x3c7   :  { %v662_v16 = vadd.f32 %v1285_v26, %v661_v29  ;;  %v1548_v30 = vpop.f32.mrb[18].mxu1  ;;  %1625 = vmatprep.subr.bf16.mxu0 %v1713_v27  ;;  %v1716_v29 = vld [vmem:[%s2004_s4 + $0x18] sm:$0xff]  }
 0x3c8   :  { %v673_v31 = vadd.f32 %v1548_v30, %v1285_v26  ;;  %v664_v32 = vpop.f32.mrb[19].mxu1  ;;  %v726_v34 = vmax.f32 %v670_v28, 0.0  ;;  %v1714_v28 = vld [vmem:[%s2004_s4 + $0x8] sm:$0xff]  }
 0x3c9   :  { %v665_v33 = vadd.f32 %v1285_v26, %v664_v32  ;;  %v724_v36 = vmax.f32 %v662_v16, 0.0  ;;  %v1717_v16 = vld [vmem:[%s2004_s4 + $0x20] sm:$0xff]   ;;  %v1718_v30 = vld [vmem:[%s2004_s4 + $0x28] sm:$0xff]  }
 0x3ca   :  { %v727_v35 = vmax.f32 %v673_v31, 0.0 }
 0x3cb   :  { %v725_v37 = vmax.f32 %v665_v33, 0.0 }
 0x3cc   :  { %v741_v38 = vpack.c.bf16 %v727_v35, %v726_v34 }
 0x3cd   :  { %v740_v39 = vpack.c.bf16 %v725_v37, %v724_v36  ;;  %v1551_v40 = vpop.f32.mrb[20].mxu1 }
 0x3ce   :  { %v686_v41 = vadd.f32 %v1551_v40, %v1285_v26  ;;  %v677_v42 = vpop.f32.mrb[21].mxu1 }
 0x3cf   :  { %v678_v43 = vadd.f32 %v1285_v26, %v677_v42  ;;  %v1552_v44 = vpop.f32.mrb[22].mxu1  ;;  %1577 = vmatprep.mubr.bf16.mxu0 %v740_v39 }
 0x3d0   :  { %v689_v45 = vadd.f32 %v1552_v44, %v1285_v26  ;;  %v680_v46 = vpop.f32.mrb[23].mxu1  ;;  %1578 = vmatmul.mubr.bf16.vlgmr.msra.gmra.mrb[32].mxu0 %v741_v38  ;;  %v730_v55 = vmax.f32 %v686_v41, 0.0 }
 0x3d1   :  { %v681_v54 = vadd.f32 %v1285_v26, %v680_v46  ;;  %v728_v58 = vmax.f32 %v678_v43, 0.0  ;;  %1626 = vmatpush3.bf16.msra.mxu0 %v1713_v27 }
 0x3d2   :  { %v731_v57 = vmax.f32 %v689_v45, 0.0  ;;  %1627 = vmatprep.subr.bf16.mxu0 %v1714_v28 }
 0x3d3   :  { %v729_v59 = vmax.f32 %v681_v54, 0.0 }
 0x3d4   :  { %v743_v56 = vpack.c.bf16 %v731_v57, %v730_v55 }
 0x3d5   :  { %v742_v60 = vpack.c.bf16 %v729_v59, %v728_v58  ;;  %v1555_v61 = vpop.f32.mrb[24].mxu1  ;;  %1628 = vmatpush3.bf16.msra.mxu0 %v1714_v28 }
 0x3d6   :  { %v702_v62 = vadd.f32 %v1555_v61, %v1285_v26  ;;  %v693_v63 = vpop.f32.mrb[25].mxu1 }
 0x3d7   :  { %v694_v0 = vadd.f32 %v1285_v26, %v693_v63  ;;  %v1556_v1 = vpop.f32.mrb[26].mxu1  ;;  %1581 = vmatprep.mubr.bf16.mxu0 %v742_v60 }
 0x3d8   :  { %v705_v2 = vadd.f32 %v1556_v1, %v1285_v26  ;;  %v696_v3 = vpop.f32.mrb[27].mxu1  ;;  %1582 = vmatmul.mubr.bf16.gmra.mrb[36].mxu0 %v743_v56  ;;  %v734_v5 = vmax.f32 %v702_v62, 0.0 }
 0x3d9   :  { %v697_v4 = vadd.f32 %v1285_v26, %v696_v3  ;;  %v732_v7 = vmax.f32 %v694_v0, 0.0 }
 0x3da   :  { %v735_v6 = vmax.f32 %v705_v2, 0.0 }
 0x3db   :  { %v733_v8 = vmax.f32 %v697_v4, 0.0 }
 0x3dc   :  { %v745_v9 = vpack.c.bf16 %v735_v6, %v734_v5 }
 0x3dd   :  { %v744_v10 = vpack.c.bf16 %v733_v8, %v732_v7  ;;  %v1559_v11 = vpop.f32.mrb[28].mxu1 }
 0x3de   :  { %v718_v12 = vadd.f32 %v1559_v11, %v1285_v26  ;;  %v709_v13 = vpop.f32.mrb[29].mxu1 }
 0x3df   :  { %v710_v14 = vadd.f32 %v1285_v26, %v709_v13  ;;  %v1560_v15 = vpop.f32.mrb[30].mxu1  ;;  %1585 = vmatprep.mubr.bf16.mxu0 %v744_v10 }
 0x3e0   :  { %v721_v17 = vadd.f32 %v1560_v15, %v1285_v26  ;;  %v712_v18 = vpop.f32.mrb[31].mxu1  ;;  %1586 = vmatmul.mubr.bf16.gmra.mrb[40].mxu0 %v745_v9  ;;  %v738_v20 = vmax.f32 %v718_v12, 0.0 }
 0x3e1   :  { %v713_v19 = vadd.f32 %v1285_v26, %v712_v18  ;;  %v736_v22 = vmax.f32 %v710_v14, 0.0  ;;  %v1715_v26 = vld [vmem:[%s2004_s4 + $0x10] sm:$0xff]  }
 0x3e2   :  { %v739_v21 = vmax.f32 %v721_v17, 0.0  ;;  %1629 = vmatprep.subr.bf16.mxu0 %v1715_v26 }
 0x3e3   :  { %v737_v23 = vmax.f32 %v713_v19, 0.0  ;;  %1630 = vmatpush3.bf16.msra.mxu0 %v1715_v26 }
 0x3e4   :  { %v747_v24 = vpack.c.bf16 %v739_v21, %v738_v20  ;;  %1631 = vmatprep.subr.bf16.mxu0 %v1716_v29 }
 0x3e5   :  { %v746_v25 = vpack.c.bf16 %v737_v23, %v736_v22 }
 0x3e7   :  { %1589 = vmatprep.mubr.bf16.mxu0 %v746_v25  ;;  %1632 = vmatpush3.bf16.msra.mxu0 %v1716_v29 }
 0x3e8   :  { %1590 = vmatmul.mubr.bf16.gmra.mrb[44].mxu0 %v747_v24  ;;  %1633 = vmatprep.subr.bf16.mxu0 %v1717_v16 }
 0x3eb   :  { %1634 = vmatpush3.bf16.msra.mxu0 %v1717_v16 }
 0x3ec   :  { %1635 = vmatprep.subr.bf16.mxu0 %v1718_v30 }
 0x3ef   :  { %1636 = vmatpush3.bf16.msra.mxu0 %v1718_v30 }
 0x4a3   :  { %v1579_v31 = vpop.f32.mrb[32].mxu0 }
 0x4a4   :  { %v847_v32 = vpop.f32.mrb[33].mxu0 }
 0x4a5   :  { %v1580_v33 = vpop.f32.mrb[34].mxu0 }
 0x4a6   :  { %v911_v34 = vpack.c.bf16 %v1580_v33, %v1579_v31  ;;  %v850_v35 = vpop.f32.mrb[35].mxu0 }
 0x4a7   :  { %v910_v36 = vpack.c.bf16 %v850_v35, %v847_v32 }
 0x4a9   :  { %1593 = vmatprep.subr.bf16.mxu1 %v910_v36 }
 0x4aa   :  { %1594 = vmatpush3.bf16.msra.mxu1 %v910_v36 }
 0x4ab   :  { %v1583_v37 = vpop.f32.mrb[36].mxu0  ;;  %1595 = vmatprep.subr.bf16.mxu1 %v911_v34 }
 0x4ac   :  { %v863_v38 = vpop.f32.mrb[37].mxu0 }
 0x4ad   :  { %v1584_v39 = vpop.f32.mrb[38].mxu0 }
 0x4ae   :  { %v913_v40 = vpack.c.bf16 %v1584_v39, %v1583_v37  ;;  %v866_v41 = vpop.f32.mrb[39].mxu0  ;;  %1596 = vmatpush3.bf16.msra.mxu1 %v911_v34 }
 0x4af   :  { %v912_v42 = vpack.c.bf16 %v866_v41, %v863_v38 }
 0x4b1   :  { %1597 = vmatprep.subr.bf16.mxu1 %v912_v42 }
 0x4b2   :  { %1598 = vmatpush3.bf16.msra.mxu1 %v912_v42 }
 0x4b3   :  { %v1587_v43 = vpop.f32.mrb[40].mxu0  ;;  %1599 = vmatprep.subr.bf16.mxu1 %v913_v40 }
 0x4b4   :  { %v879_v44 = vpop.f32.mrb[41].mxu0 }
 0x4b5   :  { %v1588_v45 = vpop.f32.mrb[42].mxu0 }
 0x4b6   :  { %v915_v46 = vpack.c.bf16 %v1588_v45, %v1587_v43  ;;  %v882_v54 = vpop.f32.mrb[43].mxu0  ;;  %1600 = vmatpush3.bf16.msra.mxu1 %v913_v40 }
 0x4b7   :  { %v914_v55 = vpack.c.bf16 %v882_v54, %v879_v44 }
 0x4b9   :  { %1601 = vmatprep.subr.bf16.mxu1 %v914_v55 }
 0x4ba   :  { %1602 = vmatpush3.bf16.msra.mxu1 %v914_v55 }
 0x4bb   :  { %v1591_v57 = vpop.f32.mrb[44].mxu0  ;;  %1603 = vmatprep.subr.bf16.mxu1 %v915_v46 }
 0x4bc   :  { %v895_v58 = vpop.f32.mrb[45].mxu0 }
 0x4bd   :  { %v1592_v59 = vpop.f32.mrb[46].mxu0 }
 0x4be   :  { %v917_v56 = vpack.c.bf16 %v1592_v59, %v1591_v57  ;;  %v898_v60 = vpop.f32.mrb[47].mxu0  ;;  %1604 = vmatpush3.bf16.msra.mxu1 %v915_v46 }
 0x4bf   :  { %v916_v61 = vpack.c.bf16 %v898_v60, %v895_v58  ;;  %v1312_v58 = vld [vmem:[%s2005_s5] ss:$0 sm:$0xff] }
 0x4c1   :  { %1605 = vmatprep.subr.bf16.mxu1 %v916_v61 }
 0x4c2   :  { %1606 = vmatpush3.bf16.msra.mxu1 %v916_v61 }
 0x4c3   :  { %1607 = vmatprep.subr.bf16.mxu1 %v917_v56 }
 0x4c6   :  { %1608 = vmatpush3.bf16.msra.mxu1 %v917_v56 }
 0x4c7   :  { %1657 = vmatprep.subr.bf16.mxu1 %v1713_v27 }
 0x4c9   :  { %1610 = vmatmul.mubr.bf16.vlgmr.msra.gmra.mrb[32].mxu1 %v1831_v47  ;;  %v1719_v47 = vld [vmem:[%s2004_s4 + $0x30] sm:$0xff]  }
 0x4ca   :  { %1613 = vmatprep.mubr.bf16.mxu1 %v1836_v48  ;;  %1665 = vmatpush3.bf16.msra.mxu1 %v1713_v27  ;;  %v1720_v48 = vld [vmem:[%s2004_s4 + $0x38] sm:$0xff]  }
 0x4cb   :  { %1658 = vmatprep.subr.bf16.mxu1 %v1714_v28  ;;  %1637 = vmatprep.subr.bf16.mxu0 %v1719_v47 }
 0x4cc   :  { %1638 = vmatpush3.bf16.msra.mxu0 %v1719_v47 }
 0x4cd   :  { %1639 = vmatprep.subr.bf16.mxu0 %v1720_v48 }
 0x4ce   :  { %1666 = vmatpush3.bf16.msra.mxu1 %v1714_v28 }
 0x4cf   :  { %1659 = vmatprep.subr.bf16.mxu1 %v1715_v26 }
 0x4d0   :  { %1640 = vmatpush3.bf16.msra.mxu0 %v1720_v48 }
 0x4d1   :  { %1614 = vmatmul.mubr.bf16.gmra.mrb[36].mxu1 %v1843_v49  ;;  %v1311_v49 = vld [vmem:[%s2003_s3 + $0x2] ss:$0 sm:$0xff] }
 0x4d2   :  { %1617 = vmatprep.mubr.bf16.mxu1 %v1848_v50  ;;  %1667 = vmatpush3.bf16.msra.mxu1 %v1715_v26 }
 0x4d3   :  { %1660 = vmatprep.subr.bf16.mxu1 %v1716_v29 }
 0x4d6   :  { %1668 = vmatpush3.bf16.msra.mxu1 %v1716_v29 }
 0x4d7   :  { %1661 = vmatprep.subr.bf16.mxu1 %v1717_v16 }
 0x4d9   :  { %1618 = vmatmul.mubr.bf16.gmra.mrb[40].mxu1 %v1855_v51 }
 0x4da   :  { %1621 = vmatprep.mubr.bf16.mxu1 %v1860_v52  ;;  %1669 = vmatpush3.bf16.msra.mxu1 %v1717_v16 }
 0x4db   :  { %1662 = vmatprep.subr.bf16.mxu1 %v1718_v30 }
 0x4de   :  { %1670 = vmatpush3.bf16.msra.mxu1 %v1718_v30 }
 0x4df   :  { %1663 = vmatprep.subr.bf16.mxu1 %v1719_v47 }
 0x4e1   :  { %1622 = vmatmul.mubr.bf16.gmra.mrb[44].mxu1 %v1867_v53 }
 0x4e2   :  { %1671 = vmatpush3.bf16.msra.mxu1 %v1719_v47 }
 0x4e3   :  { %1664 = vmatprep.subr.bf16.mxu1 %v1720_v48 }
 0x4e6   :  { %1672 = vmatpush3.bf16.msra.mxu1 %v1720_v48 }
 0x59c   :  { %v1611_v50 = vpop.f32.mrb[32].mxu1 }
 0x59d   :  { %v969_v51 = vadd.f32 %v1611_v50, %v1311_v49  ;;  %v960_v52 = vpop.f32.mrb[33].mxu1 }
 0x59e   :  { %v961_v53 = vadd.f32 %v1311_v49, %v960_v52  ;;  %v1612_v62 = vpop.f32.mrb[34].mxu1 }
 0x59f   :  { %v972_v63 = vadd.f32 %v1612_v62, %v1311_v49  ;;  %v963_v0 = vpop.f32.mrb[35].mxu1  ;;  %v1025_v2 = vmax.f32 %v969_v51, 0.0 }
 0x5a0   :  { %v964_v1 = vadd.f32 %v1311_v49, %v963_v0  ;;  %v1023_v4 = vmax.f32 %v961_v53, 0.0 }
 0x5a1   :  { %v1026_v3 = vmax.f32 %v972_v63, 0.0 }
 0x5a2   :  { %v1024_v5 = vmax.f32 %v964_v1, 0.0 }
 0x5a3   :  { %v1040_v6 = vpack.c.bf16 %v1026_v3, %v1025_v2 }
 0x5a4   :  { %v1039_v7 = vpack.c.bf16 %v1024_v5, %v1023_v4  ;;  %v1615_v8 = vpop.f32.mrb[36].mxu1 }
 0x5a5   :  { %v985_v9 = vadd.f32 %v1615_v8, %v1311_v49  ;;  %v976_v10 = vpop.f32.mrb[37].mxu1 }
 0x5a6   :  { %v977_v11 = vadd.f32 %v1311_v49, %v976_v10  ;;  %v1616_v12 = vpop.f32.mrb[38].mxu1  ;;  %1641 = vmatprep.mubr.bf16.mxu0 %v1039_v7 }
 0x5a7   :  { %v988_v13 = vadd.f32 %v1616_v12, %v1311_v49  ;;  %v979_v14 = vpop.f32.mrb[39].mxu1  ;;  %1642 = vmatmul.mubr.bf16.vlgmr.msra.gmra.mrb[48].mxu0 %v1040_v6  ;;  %v1029_v17 = vmax.f32 %v985_v9, 0.0 }
 0x5a8   :  { %v980_v15 = vadd.f32 %v1311_v49, %v979_v14  ;;  %v1027_v19 = vmax.f32 %v977_v11, 0.0 }
 0x5a9   :  { %v1030_v18 = vmax.f32 %v988_v13, 0.0 }
 0x5aa   :  { %v1028_v20 = vmax.f32 %v980_v15, 0.0 }
 0x5ab   :  { %v1042_v21 = vpack.c.bf16 %v1030_v18, %v1029_v17 }
 0x5ac   :  { %v1041_v22 = vpack.c.bf16 %v1028_v20, %v1027_v19  ;;  %v1619_v23 = vpop.f32.mrb[40].mxu1 }
 0x5ad   :  { %v1001_v24 = vadd.f32 %v1619_v23, %v1311_v49  ;;  %v992_v25 = vpop.f32.mrb[41].mxu1 }
 0x5ae   :  { %v993_v27 = vadd.f32 %v1311_v49, %v992_v25  ;;  %v1620_v28 = vpop.f32.mrb[42].mxu1  ;;  %1645 = vmatprep.mubr.bf16.mxu0 %v1041_v22 }
 0x5af   :  { %v1004_v26 = vadd.f32 %v1620_v28, %v1311_v49  ;;  %v995_v29 = vpop.f32.mrb[43].mxu1  ;;  %1646 = vmatmul.mubr.bf16.gmra.mrb[52].mxu0 %v1042_v21  ;;  %v1033_v30 = vmax.f32 %v1001_v24, 0.0 }
 0x5b0   :  { %v996_v16 = vadd.f32 %v1311_v49, %v995_v29  ;;  %v1031_v32 = vmax.f32 %v993_v27, 0.0 }
 0x5b1   :  { %v1034_v31 = vmax.f32 %v1004_v26, 0.0 }
 0x5b2   :  { %v1032_v33 = vmax.f32 %v996_v16, 0.0 }
 0x5b3   :  { %v1044_v34 = vpack.c.bf16 %v1034_v31, %v1033_v30 }
 0x5b4   :  { %v1043_v35 = vpack.c.bf16 %v1032_v33, %v1031_v32  ;;  %v1623_v36 = vpop.f32.mrb[44].mxu1 }
 0x5b5   :  { %v1017_v37 = vadd.f32 %v1623_v36, %v1311_v49  ;;  %v1008_v38 = vpop.f32.mrb[45].mxu1 }
 0x5b6   :  { %v1009_v39 = vadd.f32 %v1311_v49, %v1008_v38  ;;  %v1624_v40 = vpop.f32.mrb[46].mxu1  ;;  %1649 = vmatprep.mubr.bf16.mxu1 %v1043_v35 }
 0x5b7   :  { %v1020_v41 = vadd.f32 %v1624_v40, %v1311_v49  ;;  %v1011_v42 = vpop.f32.mrb[47].mxu1  ;;  %1650 = vmatmul.mubr.bf16.vlgmr.msra.gmra.mrb[48].mxu1 %v1044_v34  ;;  %v1037_v44 = vmax.f32 %v1017_v37, 0.0 }
 0x5b8   :  { %v1012_v43 = vadd.f32 %v1311_v49, %v1011_v42  ;;  %v1035_v46 = vmax.f32 %v1009_v39, 0.0 }
 0x5b9   :  { %v1038_v45 = vmax.f32 %v1020_v41, 0.0 }
 0x5ba   :  { %v1036_v54 = vmax.f32 %v1012_v43, 0.0 }
 0x5bb   :  { %v1046_v55 = vpack.c.bf16 %v1038_v45, %v1037_v44 }
 0x5bc   :  { %v1045_v57 = vpack.c.bf16 %v1036_v54, %v1035_v46 }
 0x5be   :  { %1653 = vmatprep.mubr.bf16.mxu1 %v1045_v57 }
 0x5bf   :  { %1654 = vmatmul.mubr.bf16.gmra.mrb[52].mxu1 %v1046_v55 }
 0x67a   :  { %v1643_v59 = vpop.f32.mrb[48].mxu0 }
 0x67b   :  { %v1161_v56 = vadd.f32 %v1643_v59, %v1312_v58  ;;  %v1152_v60 = vpop.f32.mrb[49].mxu0 }
 0x67c   :  { %v1153_v61 = vadd.f32 %v1312_v58, %v1152_v60  ;;  %v1644_v47 = vpop.f32.mrb[50].mxu0 }
 0x67d   :  { %1217 = vst [vmem:[%s2006_s6 + $0x10] sm:$0xff] %v1161_v56  ;;  %v1164_v48 = vadd.f32 %v1644_v47, %v1312_v58  ;;  %v1155_v49 = vpop.f32.mrb[51].mxu0 }
 0x67e   :  { %1215 = vst [vmem:[%s2006_s6] sm:$0xff] %v1153_v61  ;;  %v1156_v50 = vadd.f32 %v1312_v58, %v1155_v49 }
 0x67f   :  { %1218 = vst [vmem:[%s2006_s6 + $0x18] sm:$0xff] %v1164_v48 }
 0x680   :  { %1216 = vst [vmem:[%s2006_s6 + $0x8] sm:$0xff] %v1156_v50 }
 0x682   :  { %v1647_v51 = vpop.f32.mrb[52].mxu0 }
 0x683   :  { %v1177_v52 = vadd.f32 %v1647_v51, %v1312_v58  ;;  %v1168_v53 = vpop.f32.mrb[53].mxu0 }
 0x684   :  { %v1169_v62 = vadd.f32 %v1312_v58, %v1168_v53  ;;  %v1648_v63 = vpop.f32.mrb[54].mxu0 }
 0x685   :  { %1221 = vst [vmem:[%s2006_s6 + $0x30] sm:$0xff] %v1177_v52  ;;  %v1180_v0 = vadd.f32 %v1648_v63, %v1312_v58  ;;  %v1171_v1 = vpop.f32.mrb[55].mxu0 }
 0x686   :  { %1219 = vst [vmem:[%s2006_s6 + $0x20] sm:$0xff] %v1169_v62  ;;  %v1172_v2 = vadd.f32 %v1312_v58, %v1171_v1 }
 0x687   :  { %1222 = vst [vmem:[%s2006_s6 + $0x38] sm:$0xff] %v1180_v0 }
 0x688   :  { %1220 = vst [vmem:[%s2006_s6 + $0x28] sm:$0xff] %v1172_v2 }
 0x68a   :  { %v1651_v3 = vpop.f32.mrb[48].mxu1 }
 0x68b   :  { %v1193_v4 = vadd.f32 %v1651_v3, %v1312_v58  ;;  %v1184_v5 = vpop.f32.mrb[49].mxu1 }
 0x68c   :  { %v1185_v6 = vadd.f32 %v1312_v58, %v1184_v5  ;;  %v1652_v7 = vpop.f32.mrb[50].mxu1 }
 0x68d   :  { %1225 = vst [vmem:[%s2006_s6 + $0x50] sm:$0xff] %v1193_v4  ;;  %v1196_v8 = vadd.f32 %v1652_v7, %v1312_v58  ;;  %v1187_v9 = vpop.f32.mrb[51].mxu1 }
 0x68e   :  { %1223 = vst [vmem:[%s2006_s6 + $0x40] sm:$0xff] %v1185_v6  ;;  %v1188_v10 = vadd.f32 %v1312_v58, %v1187_v9 }
 0x68f   :  { %1226 = vst [vmem:[%s2006_s6 + $0x58] sm:$0xff] %v1196_v8 }
 0x690   :  { %1224 = vst [vmem:[%s2006_s6 + $0x48] sm:$0xff] %v1188_v10 }
 0x692   :  { %v1655_v11 = vpop.f32.mrb[52].mxu1 }
 0x693   :  { %v1209_v12 = vadd.f32 %v1655_v11, %v1312_v58  ;;  %v1200_v13 = vpop.f32.mrb[53].mxu1 }
 0x694   :  { %v1201_v14 = vadd.f32 %v1312_v58, %v1200_v13  ;;  %v1656_v15 = vpop.f32.mrb[54].mxu1 }
 0x695   :  { %1229 = vst [vmem:[%s2006_s6 + $0x70] sm:$0xff] %v1209_v12  ;;  %v1212_v17 = vadd.f32 %v1656_v15, %v1312_v58  ;;  %v1203_v18 = vpop.f32.mrb[55].mxu1 }
 0x696   :  { %1227 = vst [vmem:[%s2006_s6 + $0x60] sm:$0xff] %v1201_v14  ;;  %v1204_v19 = vadd.f32 %v1312_v58, %v1203_v18 }
 0x697   :  { %1230 = vst [vmem:[%s2006_s6 + $0x78] sm:$0xff] %v1212_v17 }
 0x698   :  { %1228 = vst [vmem:[%s2006_s6 + $0x68] sm:$0xff] %v1204_v19 }

</bundles_post_ra>
